<compile_context>
chip_gen: v7x
topology: tpu7x:2x2x1
jax: 0.10.0
libtpu: 0.0.40
codegen_flags: <defaults>
</compile_context>

<pallas_src>
import functools

import jax
import jax.numpy as jnp
from jax.experimental import pallas as pl
from jax.experimental.pallas import tpu as pltpu

HIDDEN = 32


def policy_resnet_kernel(
    x_ref,
    w1_ref, b1_ref,
    w2_ref, b2_ref,
    w3_ref, b3_ref,
    w4_ref, b4_ref,
    wh_ref, bh_ref,      # fused heads: [wmu | wls], [bmu | bls]
    out_ref,             # (2*act_dim, block_b): transposed, batch on lanes
    *,
    use_bf16,
):
    x = x_ref[...]

    def dense(a, w_ref, b_ref):
        w = w_ref[...]
        if use_bf16:
            # bf16 MXU operands, f32 accumulation (v6e/v7x sweet spot).
            a = a.astype(jnp.bfloat16)
            w = w.astype(jnp.bfloat16)
        return jnp.dot(a, w, preferred_element_type=jnp.float32) + b_ref[...]

    # y = relu(L1(x)); z = relu(L2(y)+y); k = relu(L3(z)+z); j = relu(L4(k)+k)
    y = jnp.maximum(dense(x, w1_ref, b1_ref), 0.0)
    z = jnp.maximum(dense(y, w2_ref, b2_ref) + y, 0.0)
    k = jnp.maximum(dense(z, w3_ref, b3_ref) + z, 0.0)
    j = jnp.maximum(dense(k, w4_ref, b4_ref) + k, 0.0)

    # Fused heads in one MXU call: h = [mu | log_std], shape (block_b, 2*act_dim).
    h = dense(j, wh_ref, bh_ref)

    # Transpose so the store is lane-dense (batch -> 128-lane axis) and the
    # exp/select below run at full VPU/EUP lane occupancy.  XLU has slack here.
    h_t = h.T                                    # (2*act_dim, block_b)

    act_dim = h_t.shape[0] // 2
    row = jax.lax.broadcasted_iota(jnp.int32, h_t.shape, dimension=0)
    is_mu = row < act_dim
    # Zero the mu rows before exp so the discarded EUP work stays finite
    # (no spurious inf in lanes the select throws away).
    out = jnp.where(is_mu, h_t, jnp.exp(jnp.where(is_mu, 0.0, h_t)))
    out_ref[...] = out.astype(out_ref.dtype)


def _round_up(n, m):
    return ((n + m - 1) // m) * m


def _pick_block_b(batch, block_b):
    """Batch-tile selection (see perf notes at top of file)."""
    if block_b is None:
        if batch < 256:
            return batch                                   # single tile, grid=(1,)
        # Large tiles remove per-step pipeline overhead; keep >=2 grid steps
        # so v7x's two TensorCores both get work; multiple of 128 keeps the
        # lane-dim block constraint of the transposed output satisfied.
        return min(4096, max(128, (batch // 256) * 128))
    block_b = min(block_b, batch)
    if block_b < batch:
        block_b = _round_up(block_b, 128)                  # (8,128) block constraint
        if block_b >= batch:
            block_b = batch
    return block_b


def policy_resnet_forward(x, params, *, block_b=None, use_bf16=False):
    """x: (B, obs_dim) float32. Returns (mu, std), each (B, action_dim) float32."""
    batch, obs_dim = x.shape
    (w1, b1, w2, b2, w3, b3, w4, b4, wh, bh) = params
    two_act = wh.shape[1]
    act_dim = two_act // 2

    block_b = _pick_block_b(batch, block_b)
    num_blocks = pl.cdiv(batch, block_b)    # trailing partial block clipped by Pallas
                                            # (no jnp.pad copy of x / over-sized out)

    def resident(a):
        # Whole-array block, constant block index: stays VMEM-resident across
        # the batch grid (no re-DMA of weights/biases).
        return pl.BlockSpec(a.shape, lambda i: (0, 0))

    in_specs = [
        pl.BlockSpec((block_b, obs_dim), lambda i: (i, 0)),
        resident(w1), resident(b1),
        resident(w2), resident(b2),
        resident(w3), resident(b3),
        resident(w4), resident(b4),
        resident(wh), resident(bh),
    ]
    # Output stored transposed: (2*act_dim, B), batch on the lane axis.
    out_spec = pl.BlockSpec((two_act, block_b), lambda i: (0, i))

    # Advisory cost estimate so XLA can overlap neighbouring ops with this kernel.
    flops = 2 * batch * (obs_dim * HIDDEN + 3 * HIDDEN * HIDDEN + HIDDEN * two_act)
    weight_bytes = sum(int(p.size) * p.dtype.itemsize for p in params)
    cost = pl.CostEstimate(
        flops=flops,
        transcendentals=batch * two_act,
        bytes_accessed=batch * (obs_dim + two_act) * 4 + weight_bytes,
    )

    # Only raise the scoped-VMEM limit when a huge tile actually needs it
    # (matters on v5e, whose default scoped VMEM is 16 MiB).
    est_vmem = (2 * block_b * obs_dim * 4        # double-buffered x tile
                + 2 * two_act * block_b * 4      # double-buffered out tile
                + 6 * block_b * HIDDEN * 4       # f32 intermediates + transpose
                + 64 * 1024)                     # weights / misc
    vmem_limit = (min(2 * est_vmem, 64 * 1024 * 1024)
                  if est_vmem > 12 * 1024 * 1024 else None)

    kernel = functools.partial(policy_resnet_kernel, use_bf16=use_bf16)

    out_t = pl.pallas_call(
        kernel,
        out_shape=jax.ShapeDtypeStruct((two_act, batch), jnp.float32),
        grid_spec=pltpu.PrefetchScalarGridSpec(
            num_scalar_prefetch=0,
            grid=(num_blocks,),
            in_specs=in_specs,
            out_specs=out_spec,
        ),
        compiler_params=pltpu.CompilerParams(
            dimension_semantics=("parallel",),
            vmem_limit_bytes=vmem_limit,
        ),
        cost_estimate=cost,
    )(x, w1, b1, w2, b2, w3, b3, w4, b4, wh, bh)

    out = out_t.T                              # layout plumbing only (no compute)
    return out[:, :act_dim], out[:, act_dim:]


def init_params(key, obs_dim, act_dim):
    """Deterministic init mimicking nn.Linear (uniform(-1/sqrt(fan_in), ...)).

    Weights are stored transposed relative to PyTorch: shape (in, out).
    Biases are (1, out).  The mu/log_std heads are pre-fused here (once),
    not per forward call.
    """
    def linear(k, fan_in, fan_out):
        kw, kb = jax.random.split(k)
        bound = 1.0 / jnp.sqrt(fan_in)
        w = jax.random.uniform(kw, (fan_in, fan_out), jnp.float32, -bound, bound)
        b = jax.random.uniform(kb, (1, fan_out), jnp.float32, -bound, bound)
        return w, b

    keys = jax.random.split(key, 6)
    w1, b1 = linear(keys[0], obs_dim, HIDDEN)
    w2, b2 = linear(keys[1], HIDDEN, HIDDEN)
    w3, b3 = linear(keys[2], HIDDEN, HIDDEN)
    w4, b4 = linear(keys[3], HIDDEN, HIDDEN)
    wmu, bmu = linear(keys[4], HIDDEN, act_dim)
    wls, bls = linear(keys[5], HIDDEN, act_dim)
    wh = jnp.concatenate([wmu, wls], axis=1)   # (HIDDEN, 2*act_dim)
    bh = jnp.concatenate([bmu, bls], axis=1)   # (1, 2*act_dim)
    return (w1, b1, w2, b2, w3, b3, w4, b4, wh, bh)


def reference_forward(x, params):
    """Pure-JAX f32 reference matching the PyTorch module semantics."""
    (w1, b1, w2, b2, w3, b3, w4, b4, wh, bh) = params
    act_dim = wh.shape[1] // 2
    y = jnp.maximum(x @ w1 + b1, 0.0)
    z = jnp.maximum(y @ w2 + b2 + y, 0.0)
    k = jnp.maximum(z @ w3 + b3 + z, 0.0)
    j = jnp.maximum(k @ w4 + b4 + k, 0.0)
    mu = j @ wh[:, :act_dim] + bh[:, :act_dim]
    std = jnp.exp(j @ wh[:, act_dim:] + bh[:, act_dim:])
    return mu, std


if __name__ == "__main__":
    key = jax.random.PRNGKey(0)
    k_params, k1, k2, k3 = jax.random.split(key, 4)

    obs_dim, act_dim = 16, 8
    params = init_params(k_params, obs_dim, act_dim)

    # 1) Small single-tile batch (grid=(1,)), exact f32 path.
    x1 = jax.random.normal(k1, (16, obs_dim), jnp.float32)
    mu1, std1 = policy_resnet_forward(x1, params)
    jax.block_until_ready((mu1, std1))
    mu1_ref, std1_ref = reference_forward(x1, params)
    assert mu1.shape == (16, act_dim) and std1.shape == (16, act_dim)
    assert jnp.allclose(mu1, mu1_ref, atol=1e-5, rtol=1e-5), "mu mismatch (single tile)"
    assert jnp.allclose(std1, std1_ref, atol=1e-5, rtol=1e-5), "std mismatch (single tile)"
    assert bool(jnp.all(std1 > 0.0)), "std must be positive"

    # 2) Ragged multi-tile batch: 2 grid steps, trailing partial block, no pad copy.
    x2 = jax.random.normal(k2, (200, obs_dim), jnp.float32)
    mu2, std2 = policy_resnet_forward(x2, params, block_b=128)
    jax.block_until_ready((mu2, std2))
    mu2_ref, std2_ref = reference_forward(x2, params)
    assert mu2.shape == (200, act_dim) and std2.shape == (200, act_dim)
    assert jnp.allclose(mu2, mu2_ref, atol=1e-5, rtol=1e-5), "mu mismatch (ragged)"
    assert jnp.allclose(std2, std2_ref, atol=1e-5, rtol=1e-5), "std mismatch (ragged)"

    # 3) Default tiling (>=2 parallel steps for v7x dual-TC) + bf16 MXU operands
    #    with f32 accumulation (v6e/v7x recommendation); bf16-level tolerance.
    x3 = jax.random.normal(k3, (256, obs_dim), jnp.float32)
    mu3, std3 = policy_resnet_forward(x3, params, use_bf16=True)
    jax.block_until_ready((mu3, std3))
    mu3_ref, std3_ref = reference_forward(x3, params)
    assert mu3.shape == (256, act_dim) and std3.shape == (256, act_dim)
    assert jnp.allclose(mu3, mu3_ref, atol=1e-1, rtol=1e-1), "mu mismatch (bf16)"
    assert jnp.allclose(std3, std3_ref, atol=1e-1, rtol=1e-1), "std mismatch (bf16)"
    assert bool(jnp.all(std3 > 0.0)), "std must be positive (bf16)"

    print("KERNEL_OK")
</pallas_src>

<mosaic_0001>
module attributes {stable_mosaic.version = 11 : i64} {
  func.func @policy_resnet_kernel(%arg0: i32, %arg1: memref<16x16xf32, #tpu.memory_space<vmem>>, %arg2: memref<16x32xf32, #tpu.memory_space<vmem>>, %arg3: memref<1x32xf32, #tpu.memory_space<vmem>>, %arg4: memref<32x32xf32, #tpu.memory_space<vmem>>, %arg5: memref<1x32xf32, #tpu.memory_space<vmem>>, %arg6: memref<32x32xf32, #tpu.memory_space<vmem>>, %arg7: memref<1x32xf32, #tpu.memory_space<vmem>>, %arg8: memref<32x32xf32, #tpu.memory_space<vmem>>, %arg9: memref<1x32xf32, #tpu.memory_space<vmem>>, %arg10: memref<32x16xf32, #tpu.memory_space<vmem>>, %arg11: memref<1x16xf32, #tpu.memory_space<vmem>>, %arg12: memref<16x16xf32, #tpu.memory_space<vmem>>) attributes {dimension_semantics = [#tpu.dimension_semantics<parallel>], iteration_bounds = array<i64: 1>, scalar_prefetch = 0 : i64, scratch_operands = 0 : i64, tpu.core_type = #tpu.core_type<tc>, window_params = [{transform_indices = @transform_0, window_bounds = array<i64: 16, 16>}, {pipeline_mode = #tpu.pipeline_mode<synchronous>, transform_indices = @transform_1, window_bounds = array<i64: 16, 32>}, {pipeline_mode = #tpu.pipeline_mode<synchronous>, transform_indices = @transform_2, window_bounds = array<i64: 1, 32>}, {pipeline_mode = #tpu.pipeline_mode<synchronous>, transform_indices = @transform_3, window_bounds = array<i64: 32, 32>}, {pipeline_mode = #tpu.pipeline_mode<synchronous>, transform_indices = @transform_4, window_bounds = array<i64: 1, 32>}, {pipeline_mode = #tpu.pipeline_mode<synchronous>, transform_indices = @transform_5, window_bounds = array<i64: 32, 32>}, {pipeline_mode = #tpu.pipeline_mode<synchronous>, transform_indices = @transform_6, window_bounds = array<i64: 1, 32>}, {pipeline_mode = #tpu.pipeline_mode<synchronous>, transform_indices = @transform_7, window_bounds = array<i64: 32, 32>}, {pipeline_mode = #tpu.pipeline_mode<synchronous>, transform_indices = @transform_8, window_bounds = array<i64: 1, 32>}, {pipeline_mode = #tpu.pipeline_mode<synchronous>, transform_indices = @transform_9, window_bounds = array<i64: 32, 16>}, {pipeline_mode = #tpu.pipeline_mode<synchronous>, transform_indices = @transform_10, window_bounds = array<i64: 1, 16>}, {transform_indices = @transform_11, window_bounds = array<i64: 16, 16>}]} {
    %c0 = arith.constant 0 : index
    %c0_0 = arith.constant 0 : index
    %0 = vector.load %arg1[%c0, %c0_0] : memref<16x16xf32, #tpu.memory_space<vmem>>, vector<16x16xf32>
    %c0_1 = arith.constant 0 : index
    %c0_2 = arith.constant 0 : index
    %1 = vector.load %arg2[%c0_1, %c0_2] : memref<16x32xf32, #tpu.memory_space<vmem>>, vector<16x32xf32>
    %cst = arith.constant dense<0.000000e+00> : vector<16x32xf32>
    %2 = tpu.matmul %0, %1, %cst {dimension_numbers = #tpu.dot_dimension_numbers<[1], [0], [0], [1], [0, 0, 1, 1], [], []>} : vector<16x16xf32>, vector<16x32xf32>, vector<16x32xf32> -> vector<16x32xf32>
    %c0_3 = arith.constant 0 : index
    %c0_4 = arith.constant 0 : index
    %3 = vector.load %arg3[%c0_3, %c0_4] : memref<1x32xf32, #tpu.memory_space<vmem>>, vector<1x32xf32>
    %4 = vector.broadcast %3 : vector<1x32xf32> to vector<16x32xf32>
    %5 = arith.addf %2, %4 : vector<16x32xf32>
    %cst_5 = arith.constant 0.000000e+00 : f32
    %6 = vector.broadcast %cst_5 : f32 to vector<16x32xf32>
    %7 = arith.maximumf %5, %6 : vector<16x32xf32>
    %c0_6 = arith.constant 0 : index
    %c0_7 = arith.constant 0 : index
    %8 = vector.load %arg4[%c0_6, %c0_7] : memref<32x32xf32, #tpu.memory_space<vmem>>, vector<32x32xf32>
    %cst_8 = arith.constant dense<0.000000e+00> : vector<16x32xf32>
    %9 = tpu.matmul %7, %8, %cst_8 {dimension_numbers = #tpu.dot_dimension_numbers<[1], [0], [0], [1], [0, 0, 1, 1], [], []>} : vector<16x32xf32>, vector<32x32xf32>, vector<16x32xf32> -> vector<16x32xf32>
    %c0_9 = arith.constant 0 : index
    %c0_10 = arith.constant 0 : index
    %10 = vector.load %arg5[%c0_9, %c0_10] : memref<1x32xf32, #tpu.memory_space<vmem>>, vector<1x32xf32>
    %11 = vector.broadcast %10 : vector<1x32xf32> to vector<16x32xf32>
    %12 = arith.addf %9, %11 : vector<16x32xf32>
    %13 = arith.addf %12, %7 : vector<16x32xf32>
    %cst_11 = arith.constant 0.000000e+00 : f32
    %14 = vector.broadcast %cst_11 : f32 to vector<16x32xf32>
    %15 = arith.maximumf %13, %14 : vector<16x32xf32>
    %c0_12 = arith.constant 0 : index
    %c0_13 = arith.constant 0 : index
    %16 = vector.load %arg6[%c0_12, %c0_13] : memref<32x32xf32, #tpu.memory_space<vmem>>, vector<32x32xf32>
    %cst_14 = arith.constant dense<0.000000e+00> : vector<16x32xf32>
    %17 = tpu.matmul %15, %16, %cst_14 {dimension_numbers = #tpu.dot_dimension_numbers<[1], [0], [0], [1], [0, 0, 1, 1], [], []>} : vector<16x32xf32>, vector<32x32xf32>, vector<16x32xf32> -> vector<16x32xf32>
    %c0_15 = arith.constant 0 : index
    %c0_16 = arith.constant 0 : index
    %18 = vector.load %arg7[%c0_15, %c0_16] : memref<1x32xf32, #tpu.memory_space<vmem>>, vector<1x32xf32>
    %19 = vector.broadcast %18 : vector<1x32xf32> to vector<16x32xf32>
    %20 = arith.addf %17, %19 : vector<16x32xf32>
    %21 = arith.addf %20, %15 : vector<16x32xf32>
    %cst_17 = arith.constant 0.000000e+00 : f32
    %22 = vector.broadcast %cst_17 : f32 to vector<16x32xf32>
    %23 = arith.maximumf %21, %22 : vector<16x32xf32>
    %c0_18 = arith.constant 0 : index
    %c0_19 = arith.constant 0 : index
    %24 = vector.load %arg8[%c0_18, %c0_19] : memref<32x32xf32, #tpu.memory_space<vmem>>, vector<32x32xf32>
    %cst_20 = arith.constant dense<0.000000e+00> : vector<16x32xf32>
    %25 = tpu.matmul %23, %24, %cst_20 {dimension_numbers = #tpu.dot_dimension_numbers<[1], [0], [0], [1], [0, 0, 1, 1], [], []>} : vector<16x32xf32>, vector<32x32xf32>, vector<16x32xf32> -> vector<16x32xf32>
    %c0_21 = arith.constant 0 : index
    %c0_22 = arith.constant 0 : index
    %26 = vector.load %arg9[%c0_21, %c0_22] : memref<1x32xf32, #tpu.memory_space<vmem>>, vector<1x32xf32>
    %27 = vector.broadcast %26 : vector<1x32xf32> to vector<16x32xf32>
    %28 = arith.addf %25, %27 : vector<16x32xf32>
    %29 = arith.addf %28, %23 : vector<16x32xf32>
    %cst_23 = arith.constant 0.000000e+00 : f32
    %30 = vector.broadcast %cst_23 : f32 to vector<16x32xf32>
    %31 = arith.maximumf %29, %30 : vector<16x32xf32>
    %c0_24 = arith.constant 0 : index
    %c0_25 = arith.constant 0 : index
    %32 = vector.load %arg10[%c0_24, %c0_25] : memref<32x16xf32, #tpu.memory_space<vmem>>, vector<32x16xf32>
    %cst_26 = arith.constant dense<0.000000e+00> : vector<16x16xf32>
    %33 = tpu.matmul %31, %32, %cst_26 {dimension_numbers = #tpu.dot_dimension_numbers<[1], [0], [0], [1], [0, 0, 1, 1], [], []>} : vector<16x32xf32>, vector<32x16xf32>, vector<16x16xf32> -> vector<16x16xf32>
    %c0_27 = arith.constant 0 : index
    %c0_28 = arith.constant 0 : index
    %34 = vector.load %arg11[%c0_27, %c0_28] : memref<1x16xf32, #tpu.memory_space<vmem>>, vector<1x16xf32>
    %35 = vector.broadcast %34 : vector<1x16xf32> to vector<16x16xf32>
    %36 = arith.addf %33, %35 : vector<16x16xf32>
    %37 = tpu.transpose %36, [1, 0] : vector<16x16xf32> -> vector<16x16xf32>
    %38 = tpu.iota {dimensions = array<i32: 0>} : vector<16x16xi32>
    %c8_i32 = arith.constant 8 : i32
    %39 = vector.broadcast %c8_i32 : i32 to vector<16x16xi32>
    %40 = arith.cmpi slt, %38, %39 : vector<16x16xi32>
    %cst_29 = arith.constant 0.000000e+00 : f32
    %41 = vector.broadcast %cst_29 : f32 to vector<16x16xf32>
    %42 = arith.select %40, %41, %37 : vector<16x16xi1>, vector<16x16xf32>
    %43 = math.exp %42 : vector<16x16xf32>
    %44 = arith.select %40, %37, %43 : vector<16x16xi1>, vector<16x16xf32>
    %c0_30 = arith.constant 0 : index
    %c0_31 = arith.constant 0 : index
    %45 = vector.load %arg12[%c0_30, %c0_31] : memref<16x16xf32, #tpu.memory_space<vmem>>, vector<16x16xf32>
    tpu.vector_store %arg12[%c0_30, %c0_31], %44 {strides = array<i32>} : memref<16x16xf32, #tpu.memory_space<vmem>>, vector<16x16xf32>,
    return
  }
  func.func @transform_0(%arg0: i32) -> (i32, i32) {
    %c0_i32 = arith.constant 0 : i32
    %c0_i32_0 = arith.constant 0 : i32
    return %arg0, %c0_i32 : i32, i32
  }
  func.func @transform_1(%arg0: i32) -> (i32, i32) {
    %c0_i32 = arith.constant 0 : i32
    %c0_i32_0 = arith.constant 0 : i32
    %c0_i32_1 = arith.constant 0 : i32
    return %c0_i32, %c0_i32_0 : i32, i32
  }
  func.func @transform_2(%arg0: i32) -> (i32, i32) {
    %c0_i32 = arith.constant 0 : i32
    %c0_i32_0 = arith.constant 0 : i32
    %c0_i32_1 = arith.constant 0 : i32
    return %c0_i32, %c0_i32_0 : i32, i32
  }
  func.func @transform_3(%arg0: i32) -> (i32, i32) {
    %c0_i32 = arith.constant 0 : i32
    %c0_i32_0 = arith.constant 0 : i32
    %c0_i32_1 = arith.constant 0 : i32
    return %c0_i32, %c0_i32_0 : i32, i32
  }
  func.func @transform_4(%arg0: i32) -> (i32, i32) {
    %c0_i32 = arith.constant 0 : i32
    %c0_i32_0 = arith.constant 0 : i32
    %c0_i32_1 = arith.constant 0 : i32
    return %c0_i32, %c0_i32_0 : i32, i32
  }
  func.func @transform_5(%arg0: i32) -> (i32, i32) {
    %c0_i32 = arith.constant 0 : i32
    %c0_i32_0 = arith.constant 0 : i32
    %c0_i32_1 = arith.constant 0 : i32
    return %c0_i32, %c0_i32_0 : i32, i32
  }
  func.func @transform_6(%arg0: i32) -> (i32, i32) {
    %c0_i32 = arith.constant 0 : i32
    %c0_i32_0 = arith.constant 0 : i32
    %c0_i32_1 = arith.constant 0 : i32
    return %c0_i32, %c0_i32_0 : i32, i32
  }
  func.func @transform_7(%arg0: i32) -> (i32, i32) {
    %c0_i32 = arith.constant 0 : i32
    %c0_i32_0 = arith.constant 0 : i32
    %c0_i32_1 = arith.constant 0 : i32
    return %c0_i32, %c0_i32_0 : i32, i32
  }
  func.func @transform_8(%arg0: i32) -> (i32, i32) {
    %c0_i32 = arith.constant 0 : i32
    %c0_i32_0 = arith.constant 0 : i32
    %c0_i32_1 = arith.constant 0 : i32
    return %c0_i32, %c0_i32_0 : i32, i32
  }
  func.func @transform_9(%arg0: i32) -> (i32, i32) {
    %c0_i32 = arith.constant 0 : i32
    %c0_i32_0 = arith.constant 0 : i32
    %c0_i32_1 = arith.constant 0 : i32
    return %c0_i32, %c0_i32_0 : i32, i32
  }
  func.func @transform_10(%arg0: i32) -> (i32, i32) {
    %c0_i32 = arith.constant 0 : i32
    %c0_i32_0 = arith.constant 0 : i32
    %c0_i32_1 = arith.constant 0 : i32
    return %c0_i32, %c0_i32_0 : i32, i32
  }
  func.func @transform_11(%arg0: i32) -> (i32, i32) {
    %c0_i32 = arith.constant 0 : i32
    %c0_i32_0 = arith.constant 0 : i32
    return %c0_i32, %arg0 : i32, i32
  }
}

</mosaic_0001>

<bundles_post_ra>
// kernel: tpu_custom_call.1
= control target key start
LH: loop header
LB: loop body
LE: loop exit
PB: predicated region body
PF: predicated region fallthrough
CT: control target
= control target key end

     0   :  { %16 = vsyncpa [#allocation3], 0  ;;  %s1142_s0 = inlined_call_operand.hbm [shape: f32[16,16], index: 0, kind: input, shape index: {}]   ;;  %s1143_s1 = inlined_call_operand.hbm [shape: f32[16,32], index: 1, kind: input, shape index: {}]   ;;  %s1144_s2 = inlined_call_operand.vmem [shape: f32[1,32], index: 2, kind: input, shape index: {}]   ;;  %s1145_s3 = inlined_call_operand.vmem [shape: f32[32,32], index: 3, kind: input, shape index: {}]   ;;  %s1146_s4 = inlined_call_operand.vmem [shape: f32[1,32], index: 4, kind: input, shape index: {}]   ;;  %s1147_s5 = inlined_call_operand.vmem [shape: f32[32,32], index: 5, kind: input, shape index: {}]   ;;  %s1148_s6 = inlined_call_operand.hbm [shape: f32[1,32], index: 6, kind: input, shape index: {}]   ;;  %s1149_s7 = inlined_call_operand.hbm [shape: f32[32,32], index: 7, kind: input, shape index: {}]   ;;  %s1150_s8 = inlined_call_operand.hbm [shape: f32[1,32], index: 8, kind: input, shape index: {}]   ;;  %s1151_s9 = inlined_call_operand.vmem [shape: f32[32,16], index: 9, kind: input, shape index: {}]   ;;  %s1152_s10 = inlined_call_operand.vmem [shape: f32[1,16], index: 10, kind: input, shape index: {}]   ;;  %s1153_s11 = inlined_call_operand.hbm [shape: f32[16,16], index: 11, kind: output, shape index: {}]  }
   0x1   :  { %17 = vsyncpa [#allocation6], 0 }
   0x2   :  { %18 = vsyncpa [#allocation9], 0 }
   0x3   :  { %19 = vsyncpa [#allocation4], 0  ;;  %s926_s17 = smov [#allocation5]   ;;  %s927_s19 = smov [#allocation8]  }
   0x4   :  { %s37_s18 = sshll.u32 %s926_s17, 4  ;;  %s67_s20 = sshll.u32 %s927_s19, 4  ;;  %s38_s18 = int_to_ptr.vmem [resolvable:$true] %s37_s18  ;;  %s994_s20 = int_to_ptr.vmem [resolvable:$true] %s67_s20 }
   0x5   :  { %s786_s23 = scalar_lea.hbm %s1143_s1, 256 }
   0x6   :  { %p787_p0 = scmp.ne.s32.totalorder %s1143_s1, %s786_s23  ;;  %p790_p1 = scmp.lt.u32.totalorder %s786_s23, %s1143_s1 }
   0x8   :  { %p792_p2 = pnand %p790_p1, %p787_p0 }
   0xa   :  { %795 = shalt.err (!%p792_p2)
}
   0xb   :  { %s796_s28 = scalar_lea.vmem %s38_s18, 256  ;;  %p801_p4 = scmp.lt.s32.totalorder %s38_s18, %s38_s18 }
   0xc   :  { %p797_p3 = scmp.ne.s32.totalorder %s38_s18, %s796_s28  ;;  %p802_p5 = scmp.lt.s32.totalorder %s796_s28, %s796_s28 }
   0xe   :  { %p803_p6 = por %p802_p5, %p801_p4 }
  0x10   :  { %p804_p7 = pnand %p803_p6, %p797_p3 }
  0x12   :  { %807 = shalt.err (!%p804_p7)
}
  0x13   :  { %s928_s29 = smov 128   ;;  %s929_s30 = smov 8  }
  0x14   :  { %43 = dma.hbm_to_vmem [thread:$0]  %s1143_s1, 256, %s38_s18, [#allocation6], %s928_s29, %s928_s29, %s929_s30  }
  0x15   :  { %s808_s16 = scalar_lea.hbm %s1149_s7, 512 }
  0x16   :  { %p809_p8 = scmp.ne.s32.totalorder %s1149_s7, %s808_s16  ;;  %p812_p9 = scmp.lt.u32.totalorder %s808_s16, %s1149_s7 }
  0x18   :  { %p814_p10 = pnand %p812_p9, %p809_p8 }
  0x1a   :  { %817 = shalt.err (!%p814_p10)
}
  0x1b   :  { %s818_s23 = scalar_lea.vmem %s994_s20, 512  ;;  %p823_p12 = scmp.lt.s32.totalorder %s994_s20, %s994_s20 }
  0x1c   :  { %p819_p11 = scmp.ne.s32.totalorder %s994_s20, %s818_s23  ;;  %p824_p13 = scmp.lt.s32.totalorder %s818_s23, %s818_s23 }
  0x1e   :  { %p825_p0 = por %p824_p13, %p823_p12 }
  0x20   :  { %p826_p1 = pnand %p825_p0, %p819_p11 }
  0x22   :  { %829 = shalt.err (!%p826_p1)
}
  0x23   :  { %73 = dma.hbm_to_vmem [thread:$0]  %s1149_s7, 512, %s994_s20, [#allocation9], %s928_s29, %s928_s29, %s929_s30  }
  0x24   :  { %s930_s24 = smov [#allocation2]   ;;  %s931_s26 = smov [#allocation7]  }
  0x25   :  { %s25_s25 = sshll.u32 %s930_s24, 4  ;;  %s58_s27 = sshll.u32 %s931_s26, 4  ;;  %s26_s25 = int_to_ptr.vmem [resolvable:$true] %s25_s25  ;;  %s59_s27 = int_to_ptr.vmem [resolvable:$true] %s58_s27 }
  0x26   :  { %s830_s13 = scalar_lea.hbm %s1142_s0, 256 }
  0x27   :  { %p831_p2 = scmp.ne.s32.totalorder %s1142_s0, %s830_s13  ;;  %p834_p3 = scmp.lt.u32.totalorder %s830_s13, %s1142_s0 }
  0x29   :  { %p836_p4 = pnand %p834_p3, %p831_p2 }
  0x2b   :  { %839 = shalt.err (!%p836_p4)
}
  0x2c   :  { %s840_s7 = scalar_lea.vmem %s26_s25, 256  ;;  %p845_p6 = scmp.lt.s32.totalorder %s26_s25, %s26_s25 }
  0x2d   :  { %p841_p5 = scmp.ne.s32.totalorder %s26_s25, %s840_s7  ;;  %p846_p7 = scmp.lt.s32.totalorder %s840_s7, %s840_s7 }
  0x2f   :  { %p847_p8 = por %p846_p7, %p845_p6 }
  0x31   :  { %p848_p9 = pnand %p847_p8, %p841_p5 }
  0x33   :  { %851 = shalt.err (!%p848_p9)
}
  0x34   :  { %31 = dma.hbm_to_vmem [thread:$0]  %s1142_s0, 256, %s26_s25, [#allocation3], %s928_s29, %s928_s29, %s929_s30  }
  0x35   :  { %s852_s23 = scalar_lea.hbm %s1148_s6, 16 }
  0x36   :  { %p853_p10 = scmp.ne.s32.totalorder %s1148_s6, %s852_s23  ;;  %p856_p11 = scmp.lt.u32.totalorder %s852_s23, %s1148_s6 }
  0x38   :  { %p858_p12 = pnand %p856_p11, %p853_p10 }
  0x3a   :  { %861 = shalt.err (!%p858_p12)
}
  0x3b   :  { %s862_s28 = scalar_lea.vmem %s59_s27, 16  ;;  %s866_s12 = scalar_lea.vmem %s59_s27, 32 }
  0x3c   :  { %p863_p13 = scmp.ne.s32.totalorder %s59_s27, %s862_s28  ;;  %p867_p0 = scmp.lt.s32.totalorder %s59_s27, %s59_s27 }
  0x3d   :  { %p868_p1 = scmp.lt.s32.totalorder %s866_s12, %s862_s28 }
  0x3f   :  { %p869_p2 = por %p868_p1, %p867_p0 }
  0x41   :  { %p870_p3 = pnand %p869_p2, %p863_p13 }
  0x43   :  { %873 = shalt.err (!%p870_p3)
}
  0x44   :  { %61 = dma.hbm_to_vmem [thread:$0]  %s1148_s6, 16, %s59_s27, [#allocation6]  }
  0x45   :  { %s932_s13 = smov [#allocation10]   ;;  %s874_s17 = scalar_lea.hbm %s1150_s8, 16 }
  0x46   :  { %s80_s14 = sshll.u32 %s932_s13, 4  ;;  %p875_p4 = scmp.ne.s32.totalorder %s1150_s8, %s874_s17  ;;  %s81_s14 = int_to_ptr.vmem [resolvable:$true] %s80_s14 }
  0x47   :  { %p878_p5 = scmp.lt.u32.totalorder %s874_s17, %s1150_s8 }
  0x49   :  { %p880_p6 = pnand %p878_p5, %p875_p4 }
  0x4b   :  { %883 = shalt.err (!%p880_p6)
}
  0x4c   :  { %s884_s22 = scalar_lea.vmem %s81_s14, 16  ;;  %s888_s6 = scalar_lea.vmem %s81_s14, 32 }
  0x4d   :  { %p885_p7 = scmp.ne.s32.totalorder %s81_s14, %s884_s22  ;;  %p889_p8 = scmp.lt.s32.totalorder %s81_s14, %s81_s14 }
  0x4e   :  { %p890_p9 = scmp.lt.s32.totalorder %s888_s6, %s884_s22 }
  0x50   :  { %p891_p10 = por %p890_p9, %p889_p8 }
  0x52   :  { %p892_p11 = pnand %p891_p10, %p885_p7 }
  0x54   :  { %895 = shalt.err (!%p892_p11)
}
  0x55   :  { %83 = dma.hbm_to_vmem [thread:$0]  %s1150_s8, 16, %s81_s14, [#allocation9]  }
  0x56   :  { %918 = dma.done.wait [#allocation3], 256  }
  0x57   :  { %919 = vsyncadd [#allocation3], 4294967040 }
  0x58   :  { %920 = dma.done.wait [#allocation6], 272  }
  0x59   :  { %921 = vsyncadd [#allocation6], 4294967024 }
  0x5a   :  { %922 = dma.done.wait [#allocation9], 528  }
  0x5b   :  { %923 = vsyncadd [#allocation9], 4294966768  ;;  %vm114_vm0 = vcmask 130048   ;;  %v105_v0 = vld [vmem:[#allocation5] sm:$0xff]  ;;  %v106_v1 = vld [vmem:[#allocation5 + $0x8] sm:$0xff]  ;;  %vm209_vm1 = vcmask 261120  }
  0x5c   :  { %v103_v2 = vld [vmem:[#allocation2] sm:$0xff]  ;;  %v739_v3 = vpack.c.bf16 %v106_v1, %v105_v0  ;;  %v199_v5 = vld [vmem:[%s1145_s3 + $0x8] sm:$0xff]  ;;  %v200_v8 = vld [vmem:[%s1145_s3 + $0x10] sm:$0xff] }
  0x5d   :  { %692 = vmatprep.mubr.msk.f32.mxu0 %vm114_vm0, %v103_v2  ;;  %v198_v4 = vld [vmem:[%s1145_s3] sm:$0xff]  ;;  %v104_v7 = vld [vmem:[#allocation2 + $0x8] sm:$0xff]  ;;  %v201_v9 = vld [vmem:[%s1145_s3 + $0x18] sm:$0xff] }
  0x5e   :  { %v743_v6 = vpack.c.bf16 %v199_v5, %v198_v4  ;;  %740 = vmatprep.subr.bf16.mxu0 %v739_v3  ;;  %v747_v10 = vpack.c.bf16 %v201_v9, %v200_v8  ;;  %v645_v11 = vld [vmem:[%s1144_s2] ss:$0 sm:$0xff]  ;;  %v296_v19 = vld [vmem:[%s1147_s5 + $0x8] sm:$0xff]  ;;  %v297_v21 = vld [vmem:[%s1147_s5 + $0x10] sm:$0xff] }
  0x5f   :  { %742 = vmatpush3.bf16.msra.mxu0 %v739_v3  ;;  %v295_v18 = vld [vmem:[%s1147_s5] sm:$0xff]  ;;  %v298_v22 = vld [vmem:[%s1147_s5 + $0x18] sm:$0xff]  ;;  %v392_v34 = vld [vmem:[#allocation8 + $0x8] sm:$0xff] }
  0x60   :  { %744 = vmatprep.subr.bf16.mxu1 %v743_v6  ;;  %v751_v20 = vpack.c.bf16 %v296_v19, %v295_v18  ;;  %v755_v23 = vpack.c.bf16 %v298_v22, %v297_v21  ;;  %v648_v24 = vld [vmem:[%s1146_s4] ss:$0 sm:$0xff]  ;;  %v391_v33 = vld [vmem:[#allocation8] sm:$0xff]  ;;  %v393_v36 = vld [vmem:[#allocation8 + $0x10] sm:$0xff] }
  0x61   :  { %746 = vmatpush3.bf16.msra.mxu1 %v743_v6  ;;  %v759_v35 = vpack.c.bf16 %v392_v34, %v391_v33  ;;  %v394_v37 = vld [vmem:[#allocation8 + $0x18] sm:$0xff]  ;;  %v488_v49 = vld [vmem:[%s1151_s9 + $0x8] sm:$0xff]  ;;  %v489_v51 = vld [vmem:[%s1151_s9 + $0x10] sm:$0xff] }
  0x62   :  { %693 = vmatmul.mubr.msk.f32.vlgmr.msra.gmra.mrb[0].mxu0 %vm114_vm0, %v104_v7  ;;  %748 = vmatprep.subr.bf16.mxu1 %v747_v10  ;;  %v763_v38 = vpack.c.bf16 %v394_v37, %v393_v36  ;;  %v651_v39 = vld [vmem:[#allocation7] ss:$0 sm:$0xff]  ;;  %v490_v52 = vld [vmem:[%s1151_s9 + $0x18] sm:$0xff]  ;;  %v654_v54 = vld [vmem:[#allocation10] ss:$0 sm:$0xff] }
  0x63   :  { %752 = vmatprep.subr.bf16.mxu0 %v751_v20  ;;  %v487_v48 = vld [vmem:[%s1151_s9] sm:$0xff]  ;;  %v771_v53 = vpack.c.bf16 %v490_v52, %v489_v51  ;;  %s933_s9 = smov [#allocation11]  }
  0x64   :  { %754 = vmatpush3.bf16.msra.mxu0 %v751_v20  ;;  %v767_v50 = vpack.c.bf16 %v488_v49, %v487_v48  ;;  %v657_v63 = vld [vmem:[%s1152_s10] ss:$0 sm:$0xff]  ;;  %s631_s8 = sshll.u32 %s933_s9, 4  ;;  %s632_s8 = int_to_ptr.vmem [resolvable:$true] %s631_s8 }
  0x65   :  { %750 = vmatpush3.bf16.msra.mxu1 %v747_v10  ;;  %756 = vmatprep.subr.bf16.mxu0 %v755_v23  ;;  %s896_s28 = scalar_lea.vmem %s632_s8, 256  ;;  %p901_p13 = scmp.lt.s32.totalorder %s632_s8, %s632_s8 }
  0x66   :  { %760 = vmatprep.subr.bf16.mxu1 %v759_v35  ;;  %p897_p12 = scmp.ne.s32.totalorder %s632_s8, %s896_s28  ;;  %p902_p0 = scmp.lt.s32.totalorder %s896_s28, %s896_s28 }
  0x68   :  { %758 = vmatpush3.bf16.msra.mxu0 %v755_v23  ;;  %p903_p1 = por %p902_p0, %p901_p13 }
  0x69   :  { %768 = vmatprep.subr.bf16.mxu0 %v767_v50 }
  0x6a   :  { %p904_p2 = pnand %p903_p1, %p897_p12 }
 0x135   :  { %v694_v12 = vpop.f32.mrb[0].mxu0 }
 0x136   :  { %v193_v13 = vadd.f32 %v694_v12, %v645_v11  ;;  %v187_v14 = vpop.f32.mrb[1].mxu0 }
 0x137   :  { %v188_v15 = vadd.f32 %v645_v11, %v187_v14 }
 0x138   :  { %v197_v17 = vmax.f32 %v193_v13, 0.0 }
 0x139   :  { %v196_v16 = vmax.f32 %v188_v15, 0.0 }
 0x13b   :  { %703 = vmatprep.mubr.msk.f32.mxu1 %vm209_vm1, %v196_v16 }
 0x13c   :  { %704 = vmatmul.mubr.msk.f32.vlgmr.msra.gmra.mrb[0].mxu1 %vm209_vm1, %v197_v17 }
 0x13d   :  { %762 = vmatpush3.bf16.msra.mxu1 %v759_v35 }
 0x13e   :  { %764 = vmatprep.subr.bf16.mxu1 %v763_v38 }
 0x141   :  { %766 = vmatpush3.bf16.msra.mxu1 %v763_v38 }
 0x20f   :  { %v705_v25 = vpop.f32.mrb[0].mxu1 }
 0x210   :  { %v288_v26 = vadd.f32 %v705_v25, %v648_v24  ;;  %v282_v27 = vpop.f32.mrb[1].mxu1 }
 0x211   :  { %v283_v28 = vadd.f32 %v648_v24, %v282_v27 }
 0x212   :  { %v292_v29 = vadd.f32 %v288_v26, %v197_v17 }
 0x213   :  { %v291_v30 = vadd.f32 %v283_v28, %v196_v16 }
 0x214   :  { %v294_v32 = vmax.f32 %v292_v29, 0.0 }
 0x215   :  { %v293_v31 = vmax.f32 %v291_v30, 0.0 }
 0x217   :  { %714 = vmatprep.mubr.msk.f32.mxu0 %vm209_vm1, %v293_v31 }
 0x218   :  { %715 = vmatmul.mubr.msk.f32.vlgmr.msra.gmra.mrb[2].mxu0 %vm209_vm1, %v294_v32 }
 0x219   :  { %770 = vmatpush3.bf16.msra.mxu0 %v767_v50 }
 0x21a   :  { %772 = vmatprep.subr.bf16.mxu0 %v771_v53 }
 0x21d   :  { %774 = vmatpush3.bf16.msra.mxu0 %v771_v53 }
 0x2eb   :  { %v716_v40 = vpop.f32.mrb[2].mxu0 }
 0x2ec   :  { %v384_v41 = vadd.f32 %v716_v40, %v651_v39  ;;  %v378_v42 = vpop.f32.mrb[3].mxu0 }
 0x2ed   :  { %v379_v43 = vadd.f32 %v651_v39, %v378_v42 }
 0x2ee   :  { %v388_v44 = vadd.f32 %v384_v41, %v294_v32 }
 0x2ef   :  { %v387_v45 = vadd.f32 %v379_v43, %v293_v31 }
 0x2f0   :  { %v390_v47 = vmax.f32 %v388_v44, 0.0 }
 0x2f1   :  { %v389_v46 = vmax.f32 %v387_v45, 0.0 }
 0x2f3   :  { %725 = vmatprep.mubr.msk.f32.mxu1 %vm209_vm1, %v389_v46 }
 0x2f4   :  { %726 = vmatmul.mubr.msk.f32.vlgmr.msra.gmra.mrb[2].mxu1 %vm209_vm1, %v390_v47 }
 0x3c7   :  { %v727_v55 = vpop.f32.mrb[2].mxu1 }
 0x3c8   :  { %v480_v56 = vadd.f32 %v727_v55, %v654_v54  ;;  %v474_v57 = vpop.f32.mrb[3].mxu1 }
 0x3c9   :  { %v475_v58 = vadd.f32 %v654_v54, %v474_v57 }
 0x3ca   :  { %v484_v59 = vadd.f32 %v480_v56, %v390_v47 }
 0x3cb   :  { %v483_v60 = vadd.f32 %v475_v58, %v389_v46 }
 0x3cc   :  { %v486_v62 = vmax.f32 %v484_v59, 0.0 }
 0x3cd   :  { %v485_v61 = vmax.f32 %v483_v60, 0.0 }
 0x3cf   :  { %736 = vmatprep.mubr.msk.f32.mxu0 %vm209_vm1, %v485_v61 }
 0x3d0   :  { %737 = vmatmul.mubr.msk.f32.vlgmr.msra.gmra.mrb[4].mxu0 %vm209_vm1, %v486_v62 }
 0x4a3   :  { %v738_v0 = vpop.f32.mrb[4].mxu0 }
 0x4a4   :  { %v570_v1 = vpop.f32.mrb[5].mxu0  ;;  %v576_v3 = vadd.f32 %v738_v0, %v657_v63 }
 0x4a5   :  { %v571_v2 = vadd.f32 %v657_v63, %v570_v1 }
 0x4a7   :  { %579 = vxpose.xlu0.b32.start [1/2] (short) (narrow) %v571_v2, 16 }
 0x4ab   :  { %580 = vxpose.xlu0.b32.end [2/2] (short) (narrow) %v576_v3, 16 }
 0x527   :  { %v595_v4 = vpop.trf.xlu0 }
 0x528   :  { %624 = vst.msk [vmem:[#allocation11] sm:$0xff] %vm114_vm0, %v595_v4 }
 0x52b   :  { %v596_v5 = vpop.trf.xlu0 }
 0x52c   :  { %v620_v6 = vmul.f32 1.442695, %v596_v5 }
 0x52e   :  { %784 = vpow2.f32 %v620_v6 }
 0x538   :  { %v785_v7 = vpop.eup %784 }
 0x539   :  { %625 = vst.msk [vmem:[#allocation11 + $0x8] sm:$0xff] %vm114_vm0, %v785_v7 }
 0x53a   :  { %907 = shalt.err (!%p904_p2)
}
 0x53b   :  { %s908_s0 = scalar_lea.hbm %s1153_s11, 256 }
 0x53c   :  { %p909_p3 = scmp.ne.s32.totalorder %s1153_s11, %s908_s0  ;;  %p912_p4 = scmp.lt.u32.totalorder %s908_s0, %s1153_s11 }
 0x53e   :  { %p914_p5 = pnand %p912_p4, %p909_p3 }
 0x540   :  { %917 = shalt.err (!%p914_p5)
}
 0x541   :  { %637 = dma.vmem_to_hbm [thread:$0]  %s632_s8, 256, %s1153_s11, [#allocation4], %s928_s29, %s928_s29, %s929_s30  }
 0x542   :  { %924 = dma.done.wait [#allocation4], 256  }
 0x543   :  { %925 = vsyncadd [#allocation4], 4294967040 }
 0x544   :  { %641 = vsyncpa [#allocation3], 1 }
 0x545   :  { %642 = vsyncpa [#allocation6], 1 }
 0x546   :  { %643 = vsyncpa [#allocation9], 1 }
 0x547   :  { %644 = vsyncpa [#allocation4], 1 }

</bundles_post_ra>
